<compile_context>
chip_gen: v7x
topology: tpu7x:2x2x1
jax: 0.10.0
libtpu: 0.0.40
codegen_flags: <defaults>
</compile_context>

<pallas_src>
import math

import jax
import jax.numpy as jnp
from jax.experimental import pallas as pl
from jax.experimental.pallas import tpu as pltpu


def _round_up(x, m):
    return ((x + m - 1) // m) * m


def _divisors(n):
    out = set()
    d = 1
    while d * d <= n:
        if n % d == 0:
            out.add(d)
            out.add(n // d)
        d += 1
    return sorted(out)


def _vmem_budget_and_limit():
    """Generation-aware (tile budget, scoped-VMEM limit) in bytes."""
    cap = None
    try:
        cap = int(pltpu.get_tpu_info().vmem_capacity_bytes)
    except Exception:
        cap = None
    if cap is not None and cap >= 112 * 1024 * 1024:
        # v5e / v6e: 128 MiB physical VMEM per TensorCore.
        return 96 * 1024 * 1024, 100 * 1024 * 1024
    # v7x (64 MiB per TC) or unknown: stay conservative, leave headroom.
    return 40 * 1024 * 1024, 44 * 1024 * 1024


# ---------------------------------------------------------------------------
# Kernels
# ---------------------------------------------------------------------------
def _make_fullk_kernel(compute_dtype):
    """Full-K matmul: a (tm, Kp) @ w_t (Kp, tn) -> o (tm, tn)."""

    def kernel(a_ref, w_ref, o_ref):
        a = a_ref[...].astype(compute_dtype)
        w = w_ref[...].astype(compute_dtype)
        o_ref[...] = jnp.dot(
            a, w, preferred_element_type=jnp.float32
        ).astype(o_ref.dtype)

    return kernel


def _make_ksplit_kernel(compute_dtype):
    """K-split fallback with an f32 VMEM accumulator across grid axis 2."""

    def kernel(a_ref, w_ref, o_ref, acc_ref):
        @pl.when(pl.program_id(2) == 0)
        def _():
            acc_ref[...] = jnp.zeros_like(acc_ref)

        a = a_ref[...].astype(compute_dtype)
        w = w_ref[...].astype(compute_dtype)
        acc_ref[...] += jnp.dot(a, w, preferred_element_type=jnp.float32)

        @pl.when(pl.program_id(2) == pl.num_programs(2) - 1)
        def _():
            o_ref[...] = acc_ref[...].astype(o_ref.dtype)

    return kernel


# ---------------------------------------------------------------------------
# Tile selection (generation-aware VMEM budget)
# ---------------------------------------------------------------------------
def _select_tiles(N, K, a_itemsize, w_itemsize, out_itemsize, budget):
    """Return (tm, tn, tk, split_k) with (8,128)-aligned, VMEM-bounded tiles."""
    Kp = _round_up(K, 128)
    big_vmem = budget >= 80 * 1024 * 1024
    tm = 512 if big_vmem else 256
    tn = min(1024 if big_vmem else 512, _round_up(N, 128))

    def footprint(tm_, tn_, tk_, split):
        b = 2 * tm_ * tk_ * a_itemsize        # double-buffered A tile
        b += 2 * tk_ * tn_ * w_itemsize       # double-buffered W^T tile
        b += 2 * tm_ * tn_ * out_itemsize     # double-buffered output tile
        if split:
            b += tm_ * tn_ * 4                # f32 accumulator scratch
        return b

    # Preferred: whole reduction dim resident, 2-D fully-"parallel" grid.
    while footprint(tm, tn, Kp, False) > budget and tm > 128:
        tm //= 2
    while footprint(tm, tn, Kp, False) > budget and tn > 256:
        tn = _round_up(tn // 2, 128)
    if footprint(tm, tn, Kp, False) <= budget:
        return tm, tn, Kp, False

    # Fallback for very large d_model: split K with tk a 128-multiple that
    # divides Kp exactly (no padding of the contraction beyond 128-align).
    for d in reversed(_divisors(Kp // 128)):
        tk = 128 * d
        if footprint(tm, tn, tk, True) <= budget:
            return tm, tn, tk, True
    return tm, tn, 128, True


# ---------------------------------------------------------------------------
# Wrapper: caches the prepared weight, mirrors UnEmbed.forward
# ---------------------------------------------------------------------------
class UnEmbedPallas:
    """Pallas equivalent of UnEmbed: forward(logits) = logits @ W_D.T.

    The (d_vocab, d_model) weight is prepared ONCE at construction (optional
    bf16 cast, transpose to (d_model, d_vocab), zero-pad to tile multiples),
    so the per-call path only pads the small activation.
    """

    def __init__(self, w_d, weight_dtype=jnp.bfloat16):
        d_vocab, d_model = w_d.shape
        self.d_vocab = int(d_vocab)
        self.d_model = int(d_model)
        self.weight_dtype = jnp.dtype(weight_dtype)
        # bf16 weights run the MXU at native rate (f32 accumulation); fp16
        # has no native MXU path, so anything non-bf16 computes in f32.
        self.compute_dtype = (
            jnp.bfloat16 if self.weight_dtype == jnp.bfloat16 else jnp.float32
        )
        # Sublane multiple for the M dim of the compute tile.
        self.m_multiple = 16 if self.compute_dtype == jnp.bfloat16 else 8

        self.vmem_budget, self.vmem_limit = _vmem_budget_and_limit()
        a_item, w_item, out_item = 4, self.weight_dtype.itemsize, 4
        tm, tn, tk, split_k = _select_tiles(
            self.d_vocab, self.d_model, a_item, w_item, out_item,
            self.vmem_budget)
        self.tm, self.tn, self.tk, self.split_k = tm, tn, tk, split_k
        self.Kp = _round_up(self.d_model, 128)
        self.Np = _round_up(self.d_vocab, tn)

        # One-time weight prep (amortized across all forward calls):
        # cast -> transpose -> pad.  Pre-transposing makes the kernel a plain
        # row-major matmul so Mosaic never needs a VMEM weight transpose.
        w_t = jnp.transpose(w_d.astype(self.weight_dtype))          # (K, N)
        pad_k = self.Kp - self.d_model
        pad_n = self.Np - self.d_vocab
        if pad_k or pad_n:
            w_t = jnp.pad(w_t, ((0, pad_k), (0, pad_n)))
        self.w_t = w_t                                              # (Kp, Np)

        # TODO(synk): int8 weight path on v5e/v6e (MXU has int8 there; v7x
        # MXU has no integer path) for a further ~2x on the weight stream.

    def __call__(self, logits):
        return self.forward(logits)

    def forward(self, logits):
        *lead, d_model = logits.shape
        assert d_model == self.d_model, "logits last dim must equal d_model"
        M = int(math.prod(lead)) if lead else 1
        K, N = self.d_model, self.d_vocab
        Kp, Np, tn = self.Kp, self.Np, self.tn
        out_dtype = logits.dtype

        tm = min(self.tm, _round_up(max(M, 1), self.m_multiple))
        Mp = _round_up(M, tm)

        a = logits.reshape(M, K)
        if (Mp, Kp) != (M, K):
            # Small per-call pad of the activation only (zeros are exact).
            a = jnp.pad(a, ((0, Mp - M), (0, Kp - K)))

        grid_n = Np // tn
        grid_m = Mp // tm
        a_item = jnp.dtype(logits.dtype).itemsize
        w_item = self.weight_dtype.itemsize
        out_item = jnp.dtype(out_dtype).itemsize

        if self.split_k:
            tk = self.tk
            grid_k = Kp // tk
            grid_spec = pltpu.PrefetchScalarGridSpec(
                num_scalar_prefetch=0,
                grid=(grid_n, grid_m, grid_k),
                in_specs=[
                    pl.BlockSpec((tm, tk), lambda j, i, k: (i, k)),
                    pl.BlockSpec((tk, tn), lambda j, i, k: (k, j)),
                ],
                out_specs=pl.BlockSpec((tm, tn), lambda j, i, k: (i, j)),
                scratch_shapes=[pltpu.VMEM((tm, tn), jnp.float32)],
            )
            kernel = _make_ksplit_kernel(self.compute_dtype)
            semantics = ("parallel", "parallel", "arbitrary")
            bytes_accessed = (grid_n * Mp * Kp * a_item
                              + grid_m * Np * Kp * w_item
                              + Mp * Np * out_item)
        else:
            # Vocab tiles outermost: the big W^T tile is held across the
            # inner M axis (fetched from HBM once per column tile), and the
            # leading "parallel" axis has >= 2 programs for v7x megacore
            # even when M fits in a single tile.
            grid_spec = pltpu.PrefetchScalarGridSpec(
                num_scalar_prefetch=0,
                grid=(grid_n, grid_m),
                in_specs=[
                    pl.BlockSpec((tm, Kp), lambda j, i: (i, 0)),
                    # TODO(synk): consider pipeline_mode=pl.Buffered(3) for
                    # this weight spec on small-K decode shapes if profiles
                    # show exposed DMA (budget the third buffer first).
                    pl.BlockSpec((Kp, tn), lambda j, i: (0, j)),
                ],
                out_specs=pl.BlockSpec((tm, tn), lambda j, i: (i, j)),
            )
            kernel = _make_fullk_kernel(self.compute_dtype)
            semantics = ("parallel", "parallel")
            bytes_accessed = (grid_n * Mp * Kp * a_item
                              + Np * Kp * w_item
                              + Mp * Np * out_item)

        cost = pl.CostEstimate(
            flops=2 * Mp * Kp * Np,
            transcendentals=0,
            bytes_accessed=bytes_accessed,
        )

        out = pl.pallas_call(
            kernel,
            out_shape=jax.ShapeDtypeStruct((Mp, Np), out_dtype),
            grid_spec=grid_spec,
            compiler_params=pltpu.CompilerParams(
                dimension_semantics=semantics,
                vmem_limit_bytes=self.vmem_limit,
            ),
            cost_estimate=cost,
        )(a, self.w_t)

        if (Mp, Np) != (M, N):
            out = out[:M, :N]
        return out.reshape(*lead, N)


if __name__ == "__main__":
    # Small config consistent with the module's forward:
    #   d_model = 128, d_vocab = 256, init_range = 0.02, dtype = float32
    batch, seq, d_model, d_vocab = 2, 8, 128, 256
    init_range = 0.02

    key = jax.random.PRNGKey(0)
    k_logits, k_w = jax.random.split(key)
    logits = jax.random.normal(k_logits, (batch, seq, d_model), dtype=jnp.float32)
    # nn.init.normal_(W_D.weight, std=init_range)
    w_d = init_range * jax.random.normal(k_w, (d_vocab, d_model), dtype=jnp.float32)

    ref = jnp.matmul(logits, w_d.T)

    # Default path: bf16 weight stream, f32 accumulation.
    mod_bf16 = UnEmbedPallas(w_d)
    out_bf16 = jax.block_until_ready(mod_bf16(logits))
    assert out_bf16.shape == (batch, seq, d_vocab)
    assert jnp.allclose(out_bf16, ref, atol=1e-2, rtol=5e-2)

    # Exact f32 path matches the reference tightly.
    mod_f32 = UnEmbedPallas(w_d, weight_dtype=jnp.float32)
    out_f32 = jax.block_until_ready(mod_f32(logits))
    assert jnp.allclose(out_f32, ref, atol=1e-4, rtol=1e-4)

    # Ragged, non tile-aligned shapes exercise the padding paths.
    logits2 = jax.random.normal(jax.random.PRNGKey(1), (3, 5, 96), dtype=jnp.float32)
    w_d2 = init_range * jax.random.normal(
        jax.random.PRNGKey(2), (300, 96), dtype=jnp.float32
    )
    ref2 = jnp.matmul(logits2, w_d2.T)

    mod2_f32 = UnEmbedPallas(w_d2, weight_dtype=jnp.float32)
    out2 = jax.block_until_ready(mod2_f32(logits2))
    assert out2.shape == (3, 5, 300)
    assert jnp.allclose(out2, ref2, atol=1e-4, rtol=1e-4)

    mod2_bf16 = UnEmbedPallas(w_d2)
    out2b = jax.block_until_ready(mod2_bf16(logits2))
    assert jnp.allclose(out2b, ref2, atol=1e-2, rtol=5e-2)

    print("KERNEL_OK")
</pallas_src>

<mosaic_0001>
module attributes {stable_mosaic.version = 11 : i64} {
  func.func @kernel(%arg0: i32, %arg1: i32, %arg2: memref<16x128xf32, #tpu.memory_space<vmem>>, %arg3: memref<128x256xbf16, #tpu.memory_space<vmem>>, %arg4: memref<16x256xf32, #tpu.memory_space<vmem>>) attributes {dimension_semantics = [#tpu.dimension_semantics<parallel>, #tpu.dimension_semantics<parallel>], iteration_bounds = array<i64: 1, 1>, scalar_prefetch = 0 : i64, scratch_operands = 0 : i64, tpu.core_type = #tpu.core_type<tc>, window_params = [{transform_indices = @transform_0, window_bounds = array<i64: 16, 128>}, {transform_indices = @transform_1, window_bounds = array<i64: 128, 256>}, {transform_indices = @transform_2, window_bounds = array<i64: 16, 256>}]} {
    %c0 = arith.constant 0 : index
    %c0_0 = arith.constant 0 : index
    %0 = vector.load %arg2[%c0, %c0_0] : memref<16x128xf32, #tpu.memory_space<vmem>>, vector<16x128xf32>
    %1 = arith.truncf %0 : vector<16x128xf32> to vector<16x128xbf16>
    %c0_1 = arith.constant 0 : index
    %c0_2 = arith.constant 0 : index
    %2 = vector.load %arg3[%c0_1, %c0_2] : memref<128x256xbf16, #tpu.memory_space<vmem>>, vector<128x256xbf16>
    %cst = arith.constant dense<0.000000e+00> : vector<16x256xf32>
    %3 = tpu.matmul %1, %2, %cst {dimension_numbers = #tpu.dot_dimension_numbers<[1], [0], [0], [1], [0, 0, 1, 1], [], []>} : vector<16x128xbf16>, vector<128x256xbf16>, vector<16x256xf32> -> vector<16x256xf32>
    %c0_3 = arith.constant 0 : index
    %c0_4 = arith.constant 0 : index
    %4 = vector.load %arg4[%c0_3, %c0_4] : memref<16x256xf32, #tpu.memory_space<vmem>>, vector<16x256xf32>
    tpu.vector_store %arg4[%c0_3, %c0_4], %3 {strides = array<i32>} : memref<16x256xf32, #tpu.memory_space<vmem>>, vector<16x256xf32>,
    return
  }
  func.func @transform_0(%arg0: i32, %arg1: i32) -> (i32, i32) {
    %c0_i32 = arith.constant 0 : i32
    %c0_i32_0 = arith.constant 0 : i32
    return %arg1, %c0_i32 : i32, i32
  }
  func.func @transform_1(%arg0: i32, %arg1: i32) -> (i32, i32) {
    %c0_i32 = arith.constant 0 : i32
    %c0_i32_0 = arith.constant 0 : i32
    return %c0_i32, %arg0 : i32, i32
  }
  func.func @transform_2(%arg0: i32, %arg1: i32) -> (i32, i32) {
    %c0_i32 = arith.constant 0 : i32
    return %arg1, %arg0 : i32, i32
  }
}

</mosaic_0001>

<bundles_post_ra>
// kernel: tpu_custom_call.1
= control target key start
LH: loop header
LB: loop body
LE: loop exit
PB: predicated region body
PF: predicated region fallthrough
CT: control target
= control target key end

     0   :  { %7 = vsyncpa [#allocation3], 0  ;;  %s384_s0 = inlined_call_operand.hbm [shape: f32[16,128], index: 0, kind: input, shape index: {}]   ;;  %s385_s1 = inlined_call_operand.hbm [shape: bf16[128,256], index: 1, kind: input, shape index: {}]   ;;  %s386_s2 = inlined_call_operand.hbm [shape: f32[16,256], index: 2, kind: output, shape index: {}]  }
   0x1   :  { %8 = vsyncpa [#allocation6], 0 }
   0x2   :  { %9 = vsyncpa [#allocation4], 0  ;;  %s325_s9 = smov [#allocation2]   ;;  %s253_s13 = scalar_lea.hbm %s384_s0, 256 }
   0x3   :  { %s15_s10 = sshll.u32 %s325_s9, 4  ;;  %p254_p0 = scmp.ne.s32.totalorder %s384_s0, %s253_s13  ;;  %s16_s10 = int_to_ptr.vmem [resolvable:$true] %s15_s10 }
   0x4   :  { %p257_p1 = scmp.lt.u32.totalorder %s253_s13, %s384_s0 }
   0x6   :  { %p259_p2 = pnand %p257_p1, %p254_p0 }
   0x8   :  { %262 = shalt.err (!%p259_p2)
}
   0x9   :  { %s263_s18 = scalar_lea.vmem %s16_s10, 256  ;;  %p268_p4 = scmp.lt.s32.totalorder %s16_s10, %s16_s10 }
   0xa   :  { %p264_p3 = scmp.ne.s32.totalorder %s16_s10, %s263_s18  ;;  %p269_p5 = scmp.lt.s32.totalorder %s263_s18, %s263_s18 }
   0xc   :  { %p270_p6 = por %p269_p5, %p268_p4 }
   0xe   :  { %p271_p7 = pnand %p270_p6, %p264_p3 }
  0x10   :  { %274 = shalt.err (!%p271_p7)
}
  0x11   :  { %s326_s19 = smov 128   ;;  %s327_s20 = smov 8  }
  0x12   :  { %21 = dma.hbm_to_vmem [thread:$0]  %s384_s0, 256, %s16_s10, [#allocation3], %s326_s19, %s326_s19, %s327_s20  }
  0x13   :  { %s328_s23 = smov [#allocation5]   ;;  %s275_s27 = scalar_lea.hbm %s385_s1, 2048 }
  0x14   :  { %s27_s24 = sshll.u32 %s328_s23, 4  ;;  %p276_p8 = scmp.ne.s32.totalorder %s385_s1, %s275_s27  ;;  %s28_s24 = int_to_ptr.vmem [resolvable:$true] %s27_s24 }
  0x15   :  { %p279_p9 = scmp.lt.u32.totalorder %s275_s27, %s385_s1 }
  0x17   :  { %p281_p10 = pnand %p279_p9, %p276_p8 }
  0x19   :  { %284 = shalt.err (!%p281_p10)
}
  0x1a   :  { %s285_s4 = scalar_lea.vmem %s28_s24, 2048  ;;  %p290_p12 = scmp.lt.s32.totalorder %s28_s24, %s28_s24 }
  0x1b   :  { %p286_p11 = scmp.ne.s32.totalorder %s28_s24, %s285_s4  ;;  %p291_p13 = scmp.lt.s32.totalorder %s285_s4, %s285_s4 }
  0x1d   :  { %p292_p0 = por %p291_p13, %p290_p12 }
  0x1f   :  { %p293_p1 = pnand %p292_p0, %p286_p11 }
  0x21   :  { %296 = shalt.err (!%p293_p1)
}
  0x22   :  { %33 = dma.hbm_to_vmem [thread:$0]  %s385_s1, 2048, %s28_s24, [#allocation6], %s326_s19, %s326_s19, %s327_s20  }
  0x23   :  { %319 = dma.done.wait [#allocation3], 256  }
  0x24   :  { %320 = vsyncadd [#allocation3], 4294967040 }
  0x25   :  { %321 = dma.done.wait [#allocation6], 2048  }
  0x26   :  { %322 = vsyncadd [#allocation6], 4294965248  ;;  %v329_v0 = vmov 0   ;;  %v229_v1 = vld [vmem:[#allocation5 + $0x4] ss:$8 sps:$4 sm:$0xff]   ;;  %v41_v17 = vld [vmem:[#allocation2] sm:$0xff] }
  0x27   :  { %172 = vmatprep.mubr.bf16.mxu0 %v329_v0  ;;  %v231_v2 = vld [vmem:[#allocation5] ss:$8 sps:$4 sm:$0xff]   ;;  %140 = vmatprep.subr.bf16.mxu0 %v229_v1  ;;  %v232_v3 = vld [vmem:[#allocation5 + $0x14] ss:$8 sps:$4 sm:$0xff]   ;;  %v234_v4 = vld [vmem:[#allocation5 + $0x10] ss:$8 sps:$4 sm:$0xff]  }
  0x28   :  { %141 = vmatpush1.bf16.msra.mxu0 %v231_v2  ;;  %v235_v5 = vld [vmem:[#allocation5 + $0x24] ss:$8 sps:$4 sm:$0xff]   ;;  %v237_v6 = vld [vmem:[#allocation5 + $0x20] ss:$8 sps:$4 sm:$0xff]   ;;  %v238_v7 = vld [vmem:[#allocation5 + $0x34] ss:$8 sps:$4 sm:$0xff]  }
  0x29   :  { %142 = vmatprep.subr.bf16.mxu0 %v232_v3  ;;  %v240_v8 = vld [vmem:[#allocation5 + $0x30] ss:$8 sps:$4 sm:$0xff]   ;;  %v241_v9 = vld [vmem:[#allocation5 + $0x44] ss:$8 sps:$4 sm:$0xff]   ;;  %v243_v10 = vld [vmem:[#allocation5 + $0x40] ss:$8 sps:$4 sm:$0xff]  }
  0x2a   :  { %v244_v11 = vld [vmem:[#allocation5 + $0x54] ss:$8 sps:$4 sm:$0xff]   ;;  %v246_v12 = vld [vmem:[#allocation5 + $0x50] ss:$8 sps:$4 sm:$0xff]   ;;  %v247_v13 = vld [vmem:[#allocation5 + $0x64] ss:$8 sps:$4 sm:$0xff]  }
  0x2b   :  { %v249_v14 = vld [vmem:[#allocation5 + $0x60] ss:$8 sps:$4 sm:$0xff]   ;;  %v250_v15 = vld [vmem:[#allocation5 + $0x74] ss:$8 sps:$4 sm:$0xff]   ;;  %v252_v16 = vld [vmem:[#allocation5 + $0x70] ss:$8 sps:$4 sm:$0xff]  }
  0x2c   :  { %143 = vmatpush1.bf16.msra.mxu0 %v234_v4  ;;  %v42_v18 = vld [vmem:[#allocation2 + $0x8] sm:$0xff]  ;;  %s330_s1 = smov [#allocation7]  }
  0x2d   :  { %144 = vmatprep.subr.bf16.mxu0 %v235_v5  ;;  %v43_v19 = vpack.c.bf16 %v42_v18, %v41_v17  ;;  %s192_s6 = sshll.u32 %s330_s1, 4  ;;  %s193_s6 = int_to_ptr.vmem [resolvable:$true] %s192_s6 }
  0x2e   :  { %s297_s7 = scalar_lea.vmem %s193_s6, 512  ;;  %p302_p3 = scmp.lt.s32.totalorder %s193_s6, %s193_s6 }
  0x2f   :  { %p298_p2 = scmp.ne.s32.totalorder %s193_s6, %s297_s7  ;;  %p303_p4 = scmp.lt.s32.totalorder %s297_s7, %s297_s7 }
  0x30   :  { %145 = vmatpush1.bf16.msra.mxu0 %v237_v6 }
  0x31   :  { %146 = vmatprep.subr.bf16.mxu0 %v238_v7  ;;  %p304_p5 = por %p303_p4, %p302_p3 }
  0x33   :  { %p305_p6 = pnand %p304_p5, %p298_p2 }
  0x34   :  { %147 = vmatpush1.bf16.msra.mxu0 %v240_v8 }
  0x35   :  { %148 = vmatprep.subr.bf16.mxu0 %v241_v9 }
  0x38   :  { %149 = vmatpush1.bf16.msra.mxu0 %v243_v10 }
  0x39   :  { %150 = vmatprep.subr.bf16.mxu0 %v244_v11 }
  0x3c   :  { %151 = vmatpush1.bf16.msra.mxu0 %v246_v12 }
  0x3d   :  { %152 = vmatprep.subr.bf16.mxu0 %v247_v13 }
  0x40   :  { %153 = vmatpush1.bf16.msra.mxu0 %v249_v14 }
  0x41   :  { %154 = vmatprep.subr.bf16.mxu0 %v250_v15 }
  0x44   :  { %155 = vmatpush1.bf16.msra.mxu0 %v252_v16 }
  0x47   :  { %173 = vmatmul.mubr.bf16.vlgmr.msra.gmra.mrb[0].mxu0 %v43_v19 }
 0x11a   :  { %v174_v20 = vpop.f32.mrb[0].mxu0 }
 0x11b   :  { %183 = vst [vmem:[#allocation7] sm:$0xff] %v174_v20  ;;  %v176_v21 = vpop.f32.mrb[1].mxu0 }
 0x11c   :  { %184 = vst [vmem:[#allocation7 + $0x8] sm:$0xff] %v176_v21  ;;  %v178_v22 = vpop.f32.mrb[2].mxu0 }
 0x11d   :  { %185 = vst [vmem:[#allocation7 + $0x10] sm:$0xff] %v178_v22  ;;  %v180_v23 = vpop.f32.mrb[3].mxu0 }
 0x11e   :  { %186 = vst [vmem:[#allocation7 + $0x18] sm:$0xff] %v180_v23 }
 0x11f   :  { %308 = shalt.err (!%p305_p6)
}
 0x120   :  { %s309_s10 = scalar_lea.hbm %s386_s2, 512 }
 0x121   :  { %p310_p7 = scmp.ne.s32.totalorder %s386_s2, %s309_s10  ;;  %p313_p8 = scmp.lt.u32.totalorder %s309_s10, %s386_s2 }
 0x123   :  { %p315_p9 = pnand %p313_p8, %p310_p7 }
 0x125   :  { %318 = shalt.err (!%p315_p9)
}
 0x126   :  { %s331_s15 = smov 256   ;;  %s332_s16 = smov 16  }
 0x127   :  { %198 = dma.vmem_to_hbm [thread:$0]  %s193_s6, 512, %s386_s2, [#allocation4], %s331_s15, %s331_s15, %s332_s16  }
 0x128   :  { %323 = dma.done.wait [#allocation4], 512  }
 0x129   :  { %324 = vsyncadd [#allocation4], 4294966784 }
 0x12a   :  { %202 = vsyncpa [#allocation3], 1 }
 0x12b   :  { %203 = vsyncpa [#allocation6], 1 }
 0x12c   :  { %204 = vsyncpa [#allocation4], 1 }

</bundles_post_ra>
